<compile_context>
chip_gen: v7x
topology: tpu7x:2x2x1
jax: 0.10.0
libtpu: 0.0.40
codegen_flags: <defaults>
</compile_context>

<pallas_src>
import functools

import jax
import jax.numpy as jnp
from jax import lax
from jax.experimental import pallas as pl
from jax.experimental.pallas import tpu as pltpu


def _latent_prior_kernel(y_ref, w_ref, b_ref, out_ref, *, n_z):
    """Single fused tile: out[:, :n_z] = mu, out[:, n_z:] = sqrt(softplus(sigma))."""
    y = y_ref[...]                                            # [TB, n_y]

    # One MXU matmul covering both heads (f32 accumulation), + bias broadcast.
    lin = jnp.dot(y, w_ref[...], preferred_element_type=jnp.float32)
    lin = lin + b_ref[...]                                    # [TB, 2*n_z]

    # Numerically stable softplus followed by sqrt (sigma_param='var').
    # Computed over the full lane width (cheap) and selected with a lane mask
    # so there is no sub-vreg lane slicing in-kernel.
    sp = jnp.maximum(lin, 0.0) + jnp.log1p(jnp.exp(-jnp.abs(lin)))
    scale = jnp.sqrt(sp)

    col = lax.broadcasted_iota(jnp.int32, lin.shape, 1)
    out_ref[...] = jnp.where(col < n_z, lin, scale).astype(out_ref.dtype)


def fuse_latent_prior_params(w_mu, b_mu, w_sigma, b_sigma):
    """One-time parameter prep (call at init, NOT per forward).

    w_mu, w_sigma: [n_y, n_z]  (transposed PyTorch Linear weights)
    b_mu, b_sigma: [n_z]
    Returns fused (w [n_y, 2*n_z], b [1, 2*n_z]).
    """
    w = jnp.concatenate([w_mu, w_sigma], axis=1)
    b = jnp.concatenate([b_mu, b_sigma], axis=0).reshape(1, -1)
    return w, b


def latent_prior_forward(y, w_fused, b_fused, *, batch_tile=8192, single_shot_max=256):
    """Returns (loc, scale) of Normal(p(z|y)) using a fused Pallas kernel.

    y:        [B, n_y]       float32
    w_fused:  [n_y, 2*n_z]   float32 (from fuse_latent_prior_params)
    b_fused:  [1, 2*n_z]     float32
    """
    if y.ndim != 2:
        raise NotImplementedError(
            f"The latent decoder function expects `y` to be 2D, "
            f"but its shape was {y.shape} instead.")

    B, n_y = y.shape
    two_nz = w_fused.shape[1]
    n_z = two_nz // 2

    kernel = functools.partial(_latent_prior_kernel, n_z=n_z)

    cost = pl.CostEstimate(
        flops=2 * B * n_y * two_nz,
        transcendentals=3 * B * two_nz,                       # exp, log1p, sqrt
        bytes_accessed=4 * (B * n_y + n_y * two_nz + two_nz + B * two_nz),
    )

    if B <= single_shot_max:
        # Small batch: single shot, everything resident in VMEM (no grid).
        full = lambda shape: pl.BlockSpec(shape, lambda: (0,) * len(shape))
        out = pl.pallas_call(
            kernel,
            out_shape=jax.ShapeDtypeStruct((B, two_nz), jnp.float32),
            grid=(),
            in_specs=[
                full((B, n_y)),
                full((n_y, two_nz)),
                full((1, two_nz)),
            ],
            out_specs=full((B, two_nz)),
            cost_estimate=cost,
        )(y, w_fused, b_fused)
    else:
        # Gridded path: 1-D parallel grid over B; weights/bias stay resident.
        # Tile is a multiple of 8 (sublane constraint) and capped so the grid
        # has at least 2 steps (keeps both v7x TensorCores busy).
        tb = max(8, (int(batch_tile) // 8) * 8)
        half = ((pl.cdiv(B, 2) + 7) // 8) * 8
        tb = min(tb, half)
        nb = pl.cdiv(B, tb)

        out = pl.pallas_call(
            kernel,
            out_shape=jax.ShapeDtypeStruct((B, two_nz), jnp.float32),
            grid=(nb,),
            in_specs=[
                pl.BlockSpec((tb, n_y), lambda i: (i, 0)),
                pl.BlockSpec((n_y, two_nz), lambda i: (0, 0)),
                pl.BlockSpec((1, two_nz), lambda i: (0, 0)),
            ],
            out_specs=pl.BlockSpec((tb, two_nz), lambda i: (i, 0)),
            cost_estimate=cost,
            compiler_params=pltpu.CompilerParams(
                dimension_semantics=("parallel",),
            ),
        )(y, w_fused, b_fused)

    # Split the lane-dense slab back into (loc, scale) in plain XLA.
    return out[:, :n_z], out[:, n_z:]


def latent_prior_forward_reference(y, w_fused, b_fused):
    """Pure-XLA fallback / reference (likely preferable at B~8 where launch cost dominates)."""
    n_z = w_fused.shape[1] // 2
    lin = y @ w_fused + b_fused
    mu, sig = lin[:, :n_z], lin[:, n_z:]
    return mu, jnp.sqrt(jax.nn.softplus(sig))


if __name__ == "__main__":
    # Small shapes consistent with the module: B=8, n_y=16 clusters, n_z=32 latent dims.
    B, n_y, n_z = 8, 16, 32

    key = jax.random.PRNGKey(0)
    k_y, k_wm, k_bm, k_ws, k_bs, k_y2 = jax.random.split(key, 6)

    # Deterministic parameter init (PyTorch nn.Linear default: U(-1/sqrt(in), 1/sqrt(in)))
    bound = 1.0 / jnp.sqrt(jnp.float32(n_y))
    w_mu = jax.random.uniform(k_wm, (n_y, n_z), jnp.float32, -bound, bound)
    b_mu = jax.random.uniform(k_bm, (n_z,), jnp.float32, -bound, bound)
    w_sigma = jax.random.uniform(k_ws, (n_y, n_z), jnp.float32, -bound, bound)
    b_sigma = jax.random.uniform(k_bs, (n_z,), jnp.float32, -bound, bound)

    # One-time parameter fusion (hoisted out of the per-forward path).
    w_fused, b_fused = fuse_latent_prior_params(w_mu, b_mu, w_sigma, b_sigma)

    # Cluster scores y (e.g. softmax outputs) [B, n_y]
    y = jax.nn.softmax(jax.random.normal(k_y, (B, n_y), jnp.float32), axis=-1)

    # --- Small-batch (grid=()) path ---
    loc, scale = latent_prior_forward(y, w_fused, b_fused)
    jax.block_until_ready((loc, scale))

    ref_loc, ref_scale = latent_prior_forward_reference(y, w_fused, b_fused)
    assert loc.shape == (B, n_z) and scale.shape == (B, n_z)
    assert jnp.allclose(loc, ref_loc, atol=1e-5, rtol=1e-5)
    assert jnp.allclose(scale, ref_scale, atol=1e-5, rtol=1e-5)

    # --- Gridded path with a ragged last block (no padding, no output slicing) ---
    B2 = 600
    y2 = jax.nn.softmax(jax.random.normal(k_y2, (B2, n_y), jnp.float32), axis=-1)

    # (a) default tile -> capped to ~B/2 so the grid has 2 parallel steps
    loc2, scale2 = latent_prior_forward(y2, w_fused, b_fused)
    # (b) explicit small tile -> 3 steps, last one ragged (600 = 2*256 + 88)
    loc3, scale3 = latent_prior_forward(y2, w_fused, b_fused, batch_tile=256)
    jax.block_until_ready((loc2, scale2, loc3, scale3))

    ref_loc2, ref_scale2 = latent_prior_forward_reference(y2, w_fused, b_fused)
    assert loc2.shape == (B2, n_z) and scale2.shape == (B2, n_z)
    assert jnp.allclose(loc2, ref_loc2, atol=1e-5, rtol=1e-5)
    assert jnp.allclose(scale2, ref_scale2, atol=1e-5, rtol=1e-5)
    assert jnp.allclose(loc3, ref_loc2, atol=1e-5, rtol=1e-5)
    assert jnp.allclose(scale3, ref_scale2, atol=1e-5, rtol=1e-5)

    print("KERNEL_OK")
</pallas_src>

<mosaic_0001>
module attributes {stable_mosaic.version = 11 : i64} {
  func.func @_latent_prior_kernel(%arg0: memref<8x16xf32, #tpu.memory_space<vmem>>, %arg1: memref<16x64xf32, #tpu.memory_space<vmem>>, %arg2: memref<1x64xf32, #tpu.memory_space<vmem>>, %arg3: memref<8x64xf32, #tpu.memory_space<vmem>>) attributes {dimension_semantics = [], scalar_prefetch = 0 : i64, scratch_operands = 0 : i64, tpu.core_type = #tpu.core_type<tc>} {
    %c0 = arith.constant 0 : index
    %c0_0 = arith.constant 0 : index
    %0 = vector.load %arg0[%c0, %c0_0] : memref<8x16xf32, #tpu.memory_space<vmem>>, vector<8x16xf32>
    %c0_1 = arith.constant 0 : index
    %c0_2 = arith.constant 0 : index
    %1 = vector.load %arg1[%c0_1, %c0_2] : memref<16x64xf32, #tpu.memory_space<vmem>>, vector<16x64xf32>
    %cst = arith.constant dense<0.000000e+00> : vector<8x64xf32>
    %2 = tpu.matmul %0, %1, %cst {dimension_numbers = #tpu.dot_dimension_numbers<[1], [0], [0], [1], [0, 0, 1, 1], [], []>} : vector<8x16xf32>, vector<16x64xf32>, vector<8x64xf32> -> vector<8x64xf32>
    %c0_3 = arith.constant 0 : index
    %c0_4 = arith.constant 0 : index
    %3 = vector.load %arg2[%c0_3, %c0_4] : memref<1x64xf32, #tpu.memory_space<vmem>>, vector<1x64xf32>
    %4 = vector.broadcast %3 : vector<1x64xf32> to vector<8x64xf32>
    %5 = arith.addf %2, %4 : vector<8x64xf32>
    %cst_5 = arith.constant 0.000000e+00 : f32
    %6 = vector.broadcast %cst_5 : f32 to vector<8x64xf32>
    %7 = arith.maximumf %5, %6 : vector<8x64xf32>
    %8 = math.absf %5 : vector<8x64xf32>
    %cst_6 = arith.constant 0.000000e+00 : f32
    %9 = vector.broadcast %cst_6 : f32 to vector<8x64xf32>
    %10 = arith.subf %9, %8 : vector<8x64xf32>
    %11 = math.exp %10 : vector<8x64xf32>
    %12 = math.log1p %11 : vector<8x64xf32>
    %13 = arith.addf %7, %12 : vector<8x64xf32>
    %14 = math.sqrt %13 : vector<8x64xf32>
    %15 = tpu.iota {dimensions = array<i32: 1>} : vector<8x64xi32>
    %c32_i32 = arith.constant 32 : i32
    %16 = vector.broadcast %c32_i32 : i32 to vector<8x64xi32>
    %17 = arith.cmpi slt, %15, %16 : vector<8x64xi32>
    %18 = arith.select %17, %5, %14 : vector<8x64xi1>, vector<8x64xf32>
    %c0_7 = arith.constant 0 : index
    %c0_8 = arith.constant 0 : index
    %19 = vector.load %arg3[%c0_7, %c0_8] : memref<8x64xf32, #tpu.memory_space<vmem>>, vector<8x64xf32>
    tpu.vector_store %arg3[%c0_7, %c0_8], %18 {strides = array<i32>} : memref<8x64xf32, #tpu.memory_space<vmem>>, vector<8x64xf32>,
    return
  }
}

</mosaic_0001>

<bundles_post_ra>
// kernel: tpu_custom_call.1
= control target key start
LH: loop header
LB: loop body
LE: loop exit
PB: predicated region body
PF: predicated region fallthrough
CT: control target
= control target key end

     0   :  { %8 = vsyncpa [#allocation3], 0  ;;  %s344_s0 = inlined_call_operand.hbm [shape: f32[8,16], index: 0, kind: input, shape index: {}]   ;;  %s345_s1 = inlined_call_operand.hbm [shape: f32[16,64], index: 1, kind: input, shape index: {}]   ;;  %s346_s2 = inlined_call_operand.vmem [shape: f32[1,64], index: 2, kind: input, shape index: {}]   ;;  %s347_s3 = inlined_call_operand.hbm [shape: f32[8,64], index: 3, kind: output, shape index: {}]  }
   0x1   :  { %9 = vsyncpa [#allocation6], 0 }
   0x2   :  { %10 = vsyncpa [#allocation4], 0  ;;  %s270_s12 = smov [#allocation2]   ;;  %s271_s14 = smov [#allocation5]  }
   0x3   :  { %s17_s13 = sshll.u32 %s270_s12, 4  ;;  %s26_s15 = sshll.u32 %s271_s14, 4  ;;  %s18_s13 = int_to_ptr.vmem [resolvable:$true] %s17_s13  ;;  %s298_s15 = int_to_ptr.vmem [resolvable:$true] %s26_s15 }
   0x4   :  { %s198_s18 = scalar_lea.hbm %s344_s0, 128 }
   0x5   :  { %p199_p0 = scmp.ne.s32.totalorder %s344_s0, %s198_s18  ;;  %p202_p1 = scmp.lt.u32.totalorder %s198_s18, %s344_s0 }
   0x7   :  { %p204_p2 = pnand %p202_p1, %p199_p0 }
   0x9   :  { %207 = shalt.err (!%p204_p2)
}
   0xa   :  { %s208_s23 = scalar_lea.vmem %s18_s13, 128  ;;  %p213_p4 = scmp.lt.s32.totalorder %s18_s13, %s18_s13 }
   0xb   :  { %p209_p3 = scmp.ne.s32.totalorder %s18_s13, %s208_s23  ;;  %p214_p5 = scmp.lt.s32.totalorder %s208_s23, %s208_s23 }
   0xd   :  { %p215_p6 = por %p214_p5, %p213_p4 }
   0xf   :  { %p216_p7 = pnand %p215_p6, %p209_p3 }
  0x11   :  { %219 = shalt.err (!%p216_p7)
}
  0x12   :  { %20 = dma.hbm_to_vmem [thread:$0]  %s344_s0, 128, %s18_s13, [#allocation3]  }
  0x13   :  { %s220_s28 = scalar_lea.hbm %s345_s1, 256 }
  0x14   :  { %p221_p8 = scmp.ne.s32.totalorder %s345_s1, %s220_s28  ;;  %p224_p9 = scmp.lt.u32.totalorder %s220_s28, %s345_s1 }
  0x16   :  { %p226_p10 = pnand %p224_p9, %p221_p8 }
  0x18   :  { %229 = shalt.err (!%p226_p10)
}
  0x19   :  { %s230_s6 = scalar_lea.vmem %s298_s15, 256  ;;  %p235_p12 = scmp.lt.s32.totalorder %s298_s15, %s298_s15 }
  0x1a   :  { %p231_p11 = scmp.ne.s32.totalorder %s298_s15, %s230_s6  ;;  %p236_p13 = scmp.lt.s32.totalorder %s230_s6, %s230_s6 }
  0x1c   :  { %p237_p0 = por %p236_p13, %p235_p12 }
  0x1e   :  { %p238_p1 = pnand %p237_p0, %p231_p11 }
  0x20   :  { %241 = shalt.err (!%p238_p1)
}
  0x21   :  { %s272_s0 = smov 128   ;;  %s273_s7 = smov 8  }
  0x22   :  { %32 = dma.hbm_to_vmem [thread:$0]  %s345_s1, 256, %s298_s15, [#allocation6], %s272_s0, %s272_s0, %s273_s7  }
  0x23   :  { %264 = dma.done.wait [#allocation3], 128  }
  0x24   :  { %265 = vsyncadd [#allocation3], 4294967168 }
  0x25   :  { %266 = dma.done.wait [#allocation6], 256  }
  0x26   :  { %267 = vsyncadd [#allocation6], 4294967040  ;;  %v274_v0 = vmov 0.0|0.0   ;;  %vm275_vm0 = vmmov 0   ;;  %v276_v1 = vmov 0.0   ;;  %v42_v2 = vld [vmem:[#allocation5] sm:$0xff]  ;;  %v147_v24 = vlaneseq }
  0x27   :  { %181 = vmatprep.subr.bf16.mxu0 %v274_v0  ;;  %178 = vmatprep.mubr.msk.f32.mxu0 %vm275_vm0, %v276_v1  ;;  %v43_v3 = vld [vmem:[#allocation5 + $0x8] sm:$0xff]  ;;  %v41_v5 = vld [vmem:[#allocation2] sm:$0xff]  ;;  %vm51_vm1 = vcmask 130048   ;;  %s277_s1 = smov [#allocation7]   ;;  %vm151_vm6 = vcmask 523264  }
  0x28   :  { %v182_v4 = vpack.c.bf16 %v43_v3, %v42_v2  ;;  %v169_v6 = vld [vmem:[%s346_s2] ss:$0 sm:$0xff]  ;;  %v148_v25 = vand.u32 127, %v147_v24  ;;  %s159_s2 = sshll.u32 %s277_s1, 4  ;;  %s160_s2 = int_to_ptr.vmem [resolvable:$true] %s159_s2 }
  0x29   :  { %s242_s12 = scalar_lea.vmem %s160_s2, 128  ;;  %p247_p3 = scmp.lt.s32.totalorder %s160_s2, %s160_s2 }
  0x2a   :  { %183 = vmatpush3.bf16.msra.mxu0 %v182_v4  ;;  %vm149_vm4 = vcmp.lt.s32.totalorder %v148_v25, 32  ;;  %p243_p2 = scmp.ne.s32.totalorder %s160_s2, %s242_s12  ;;  %p248_p4 = scmp.lt.s32.totalorder %s242_s12, %s242_s12 }
  0x2c   :  { %p249_p5 = por %p248_p4, %p247_p3 }
  0x2d   :  { %179 = vmatmul.mubr.msk.f32.vlgmr.msra.gmra.mrb[0].mxu0 %vm51_vm1, %v41_v5 }
  0x2e   :  { %p250_p6 = pnand %p249_p5, %p243_p2 }
 0x100   :  { %v121_v7 = vpop.f32.mrb[0].mxu0 }
 0x101   :  { %v122_v8 = vadd.f32 %v169_v6, %v121_v7  ;;  %v180_v9 = vpop.f32.mrb[1].mxu0 }
 0x103   :  { %v126_v10 = vand.u32 2147483647, %v122_v8  ;;  %v125_v21 = vmax.f32 %v122_v8, 0.0 }
 0x105   :  { %v127_v11 = vsub.f32 0.0, %v126_v10 }
 0x107   :  { %v128_v12 = vmul.f32 1.442695, %v127_v11 }
 0x109   :  { %192 = vpow2.f32 %v128_v12 }
 0x113   :  { %v193_v13 = vpop.eup %192 }
 0x114   :  { %v130_v14 = vadd.f32 1.0, %v193_v13  ;;  %v133_v15 = vmul.f32 -0.5, %v193_v13  ;;  %v136_v17 = vand.u32 2147483647, %v193_v13 }
 0x116   :  { %194 = vlog2.f32 %v130_v14  ;;  %v134_v16 = vadd.f32 1.0, %v133_v15  ;;  %vm137_vm2 = vcmp.lt.f32.partialorder %v136_v17, 0.0004427343 }
 0x118   :  { %v135_v20 = vmul.f32 %v193_v13, %v134_v16 }
 0x120   :  { %v195_v18 = vpop.eup %194 }
 0x121   :  { %v132_v19 = vmul.f32 0.6931472, %v195_v18 }
 0x123   :  { %v138_v22 = vsel %vm137_vm2, %v135_v20, %v132_v19 }
 0x124   :  { %v139_v23 = vadd.f32 %v138_v22, %v125_v21 }
 0x126   :  { %196 = vrsqrt.f32 %v139_v23  ;;  %vm142_vm3 = vcmp.eq.f32.partialorder %v139_v23, inf  ;;  %v145_v28 = vand.u32 2147483648, %v139_v23  ;;  %vm144_vm5 = vcmp.eq.f32.partialorder %v139_v23, 0.0 }
 0x130   :  { %v197_v26 = vpop.eup %196 }
 0x131   :  { %v141_v27 = vmul.f32 %v197_v26, %v139_v23 }
 0x133   :  { %v143_v29 = vsel %vm142_vm3, %v139_v23, %v141_v27 }
 0x134   :  { %v146_v30 = vsel %vm144_vm5, %v145_v28, %v143_v29 }
 0x135   :  { %v150_v31 = vsel %vm149_vm4, %v122_v8, %v146_v30 }
 0x136   :  { %152 = vst.msk [vmem:[#allocation7] sm:$0xff] %vm151_vm6, %v150_v31 }
 0x137   :  { %253 = shalt.err (!%p250_p6)
}
 0x138   :  { %s254_s15 = scalar_lea.hbm %s347_s3, 128 }
 0x139   :  { %p255_p7 = scmp.ne.s32.totalorder %s347_s3, %s254_s15  ;;  %p258_p8 = scmp.lt.u32.totalorder %s254_s15, %s347_s3 }
 0x13b   :  { %p260_p9 = pnand %p258_p8, %p255_p7 }
 0x13d   :  { %263 = shalt.err (!%p260_p9)
}
 0x13e   :  { %162 = dma.vmem_to_hbm [thread:$0]  %s160_s2, 128, %s347_s3, [#allocation4]  }
 0x13f   :  { %268 = dma.done.wait [#allocation4], 128  }
 0x140   :  { %269 = vsyncadd [#allocation4], 4294967168 }
 0x141   :  { %166 = vsyncpa [#allocation3], 1 }
 0x142   :  { %167 = vsyncpa [#allocation6], 1 }
 0x143   :  { %168 = vsyncpa [#allocation4], 1 }

</bundles_post_ra>
